<compile_context>
chip_gen: v7x
topology: tpu7x:2x2x1
jax: 0.10.0
libtpu: 0.0.40
codegen_flags: <defaults>
</compile_context>

<pallas_src>
import jax
import jax.numpy as jnp
from jax.experimental import pallas as pl
from jax.experimental.pallas import tpu as pltpu  # noqa: F401  (kept for TPU-only variants)

LANE = 128     # lane width: latent axis padded to this
SUBLANE = 8    # sublane alignment for output rows


# ----------------------------------------------------------------------------
# Fused kernel: flatten-MLP (merged mu|log_var head) + reparameterization
# ----------------------------------------------------------------------------
def fused_encoder_kernel(x_ref, w1_ref, b1_ref, w2_ref, b2_ref, eps_ref,
                         stats_ref, z_ref):
    Lp = z_ref.shape[-1]                              # lane-padded latent width (128)

    # ---- Layer 1: Linear -> ReLU (bf16 MXU operands, f32 accumulate) --------
    xb = x_ref[...].astype(jnp.bfloat16)              # in-kernel cast (x arrives f32)
    h = jnp.dot(xb, w1_ref[...], preferred_element_type=jnp.float32)
    h = jnp.maximum(h + b1_ref[...], 0.0)
    hb = h.astype(jnp.bfloat16)

    # ---- Layer 2: single merged (mu | log_var) head, N = 2*Lp = 256 ---------
    out2 = jnp.dot(hb, w2_ref[...], preferred_element_type=jnp.float32) + b2_ref[...]
    mu = out2[:, :Lp]                                  # lane-aligned slice (free)
    lv = out2[:, Lp:]
    std = jnp.exp(0.5 * lv)                            # EUP; padded lanes lv==0 -> std==1

    # Coalesced stats slab: [mu | log_var | std], all lane-aligned stores.
    stats_ref[:, 0 * Lp:1 * Lp] = mu
    stats_ref[:, 1 * Lp:2 * Lp] = lv
    stats_ref[:, 2 * Lp:3 * Lp] = std

    # ---- Reparameterization: z = mu + std * eps, leading-axis broadcast -----
    z_ref[...] = mu[None, :, :] + std[None, :, :] * eps_ref[...]


def _fused_encoder_call(x_pad, w1, b1, w2, b2, eps):
    Bp, F = x_pad.shape
    Hp = w1.shape[1]
    L2 = w2.shape[1]
    Lp = L2 // 2
    S = eps.shape[0]

    def full2d(shape):
        return pl.BlockSpec(shape, lambda: (0, 0))

    def full3d(shape):
        return pl.BlockSpec(shape, lambda: (0, 0, 0))

    out_shape = (
        jax.ShapeDtypeStruct((Bp, 3 * Lp), jnp.float32),   # [mu | log_var | std]
        jax.ShapeDtypeStruct((S, Bp, Lp), jnp.float32),    # z, (s, b, l) order
    )
    return pl.pallas_call(
        fused_encoder_kernel,
        out_shape=out_shape,
        in_specs=[
            full2d((Bp, F)),        # x (f32, cast in-kernel)
            full2d((F, Hp)),        # w1 (bf16)
            full2d((1, Hp)),        # b1 (f32)
            full2d((Hp, L2)),       # merged w2 (bf16)
            full2d((1, L2)),        # merged b2 (f32)
            full3d((S, Bp, Lp)),    # eps
        ],
        out_specs=(
            full2d((Bp, 3 * Lp)),
            full3d((S, Bp, Lp)),
        ),
    )(x_pad, w1, b1, w2, b2, eps)


# ----------------------------------------------------------------------------
# Encoder forward (wrapper = layout glue only; all compute is in the kernel)
# ----------------------------------------------------------------------------
def encoder_forward(x_nchw, params, eps_key, latent_dim,
                    mc_sample_z=None, iwae_sample_z=None):
    mc = 1 if mc_sample_z is None else mc_sample_z
    iwae = 1 if iwae_sample_z is None else iwae_sample_z
    S = iwae * mc

    w1, b1, w2, b2 = params
    Lp = w2.shape[1] // 2

    B = x_nchw.shape[0]
    x_flat = x_nchw.reshape(B, -1)                       # flatten NCHW (stays f32)
    Bp = pl.cdiv(B, SUBLANE) * SUBLANE
    x_pad = jnp.pad(x_flat, ((0, Bp - B), (0, 0)))       # sublane-align rows

    # eps ~ N(0,1) generated host-side (pltpu PRNG has no interpret/CPU lowering).
    # Caller must supply a fresh key per step for fresh samples.
    eps = jax.random.normal(eps_key, (S, Bp, Lp), dtype=jnp.float32)

    stats, z_p = _fused_encoder_call(x_pad, w1, b1, w2, b2, eps)

    L = latent_dim
    mu = stats[:B, :L]
    log_var = stats[:B, Lp:Lp + L]
    std = stats[:B, 2 * Lp:2 * Lp + L]
    _out = jnp.concatenate([mu, log_var], axis=1)        # [B, 2L] == encoder_network(x)
    z = z_p[:, :B, :L].reshape(iwae, mc, B, L)           # [iwae, mc, B, L]
    dist = (mu, std)                                     # ReparamTrickNormal params
    return _out, z, dist


# ----------------------------------------------------------------------------
# Deterministic parameter init: Linear(F,H) -> ReLU -> Linear(H, 2L), with the
# hidden dim padded to 128 lanes and the second layer merged + lane-padded.
# ----------------------------------------------------------------------------
def init_params(key, in_features, hidden, latent_dim):
    Lp = pl.cdiv(latent_dim, LANE) * LANE
    Hp = pl.cdiv(hidden, LANE) * LANE
    k1, k2, k3, k4 = jax.random.split(key, 4)
    s1 = 1.0 / jnp.sqrt(in_features)
    s2 = 1.0 / jnp.sqrt(hidden)
    w1 = jax.random.uniform(k1, (in_features, hidden), jnp.float32, -s1, s1)
    b1 = jax.random.uniform(k2, (1, hidden), jnp.float32, -s1, s1)
    w2 = jax.random.uniform(k3, (hidden, 2 * latent_dim), jnp.float32, -s2, s2)
    b2 = jax.random.uniform(k4, (1, 2 * latent_dim), jnp.float32, -s2, s2)

    # Pad hidden dim to Hp (zeros -> ReLU(0)=0, and w2 rows beyond hidden are 0).
    w1_p = jnp.zeros((in_features, Hp), jnp.float32).at[:, :hidden].set(w1)
    b1_p = jnp.zeros((1, Hp), jnp.float32).at[:, :hidden].set(b1)

    # Merged head: columns [0:L) = mu weights, [Lp:Lp+L) = log_var weights.
    w2_p = jnp.zeros((Hp, 2 * Lp), jnp.float32)
    w2_p = w2_p.at[:hidden, :latent_dim].set(w2[:, :latent_dim])
    w2_p = w2_p.at[:hidden, Lp:Lp + latent_dim].set(w2[:, latent_dim:])
    b2_p = jnp.zeros((1, 2 * Lp), jnp.float32)
    b2_p = b2_p.at[:, :latent_dim].set(b2[:, :latent_dim])
    b2_p = b2_p.at[:, Lp:Lp + latent_dim].set(b2[:, latent_dim:])

    # bf16 MXU operands (f32 accumulation inside the kernel); biases stay f32.
    return (w1_p.astype(jnp.bfloat16), b1_p, w2_p.astype(jnp.bfloat16), b2_p)


if __name__ == "__main__":
    key = jax.random.PRNGKey(0)
    k_x, k_p, k_eps = jax.random.split(key, 3)

    B, C, Himg, Wimg = 2, 4, 16, 16
    latent_dim = 10
    hidden = 32
    iwae_sample_z, mc_sample_z = 2, 3

    x = jax.random.normal(k_x, (B, C, Himg, Wimg), dtype=jnp.float32)
    params = init_params(k_p, C * Himg * Wimg, hidden, latent_dim)

    _out, z, (mu, std) = encoder_forward(
        x, params, k_eps, latent_dim,
        mc_sample_z=mc_sample_z, iwae_sample_z=iwae_sample_z,
    )
    jax.block_until_ready((_out, z, mu, std))

    assert _out.shape == (B, 2 * latent_dim)
    assert z.shape == (iwae_sample_z, mc_sample_z, B, latent_dim)
    assert mu.shape == (B, latent_dim) and std.shape == (B, latent_dim)

    # Cross-check against a plain-JAX reference computed with the same
    # bf16-operand / f32-accumulate math (the true deviation from an f32
    # PyTorch Encoder is larger than this tolerance; that is expected).
    w1, b1, w2, b2 = params
    Lp = w2.shape[1] // 2
    x_flat = x.reshape(B, -1)
    ref_h = jnp.maximum(
        jnp.dot(x_flat.astype(jnp.bfloat16), w1, preferred_element_type=jnp.float32) + b1, 0.0)
    ref_hb = ref_h.astype(jnp.bfloat16)
    ref2 = jnp.dot(ref_hb, w2, preferred_element_type=jnp.float32) + b2
    ref_mu = ref2[:, :latent_dim]
    ref_lv = ref2[:, Lp:Lp + latent_dim]
    ref_std = jnp.exp(0.5 * ref_lv)
    ref_out = jnp.concatenate([ref_mu, ref_lv], axis=1)
    assert jnp.allclose(_out, ref_out, atol=2e-3, rtol=2e-3), \
        float(jnp.max(jnp.abs(_out - ref_out)))
    assert jnp.allclose(std, ref_std, atol=2e-3, rtol=2e-3)

    # Exact stochastic-path check: rebuild the same eps and compare z.
    S = iwae_sample_z * mc_sample_z
    Bp = pl.cdiv(B, SUBLANE) * SUBLANE
    eps = jax.random.normal(k_eps, (S, Bp, Lp), dtype=jnp.float32)
    ref_z = (ref_mu[None] + ref_std[None] * eps[:, :B, :latent_dim]
             ).reshape(iwae_sample_z, mc_sample_z, B, latent_dim)
    assert jnp.allclose(z, ref_z, atol=2e-3, rtol=2e-3), \
        float(jnp.max(jnp.abs(z - ref_z)))
    assert bool(jnp.all(jnp.isfinite(z)))

    print("KERNEL_OK")
</pallas_src>

<mosaic_0001>
module attributes {stable_mosaic.version = 11 : i64} {
  func.func @fused_encoder_kernel(%arg0: memref<8x1024xf32, #tpu.memory_space<vmem>>, %arg1: memref<1024x128xbf16, #tpu.memory_space<vmem>>, %arg2: memref<1x128xf32, #tpu.memory_space<vmem>>, %arg3: memref<128x256xbf16, #tpu.memory_space<vmem>>, %arg4: memref<1x256xf32, #tpu.memory_space<vmem>>, %arg5: memref<6x8x128xf32, #tpu.memory_space<vmem>>, %arg6: memref<8x384xf32, #tpu.memory_space<vmem>>, %arg7: memref<6x8x128xf32, #tpu.memory_space<vmem>>) attributes {dimension_semantics = [], scalar_prefetch = 0 : i64, scratch_operands = 0 : i64, tpu.core_type = #tpu.core_type<tc>} {
    %c0 = arith.constant 0 : index
    %c0_0 = arith.constant 0 : index
    %0 = vector.load %arg0[%c0, %c0_0] : memref<8x1024xf32, #tpu.memory_space<vmem>>, vector<8x1024xf32>
    %1 = arith.truncf %0 : vector<8x1024xf32> to vector<8x1024xbf16>
    %c0_1 = arith.constant 0 : index
    %c0_2 = arith.constant 0 : index
    %2 = vector.load %arg1[%c0_1, %c0_2] : memref<1024x128xbf16, #tpu.memory_space<vmem>>, vector<1024x128xbf16>
    %cst = arith.constant dense<0.000000e+00> : vector<8x128xf32>
    %3 = tpu.matmul %1, %2, %cst {dimension_numbers = #tpu.dot_dimension_numbers<[1], [0], [0], [1], [0, 0, 1, 1], [], []>} : vector<8x1024xbf16>, vector<1024x128xbf16>, vector<8x128xf32> -> vector<8x128xf32>
    %c0_3 = arith.constant 0 : index
    %c0_4 = arith.constant 0 : index
    %4 = vector.load %arg2[%c0_3, %c0_4] : memref<1x128xf32, #tpu.memory_space<vmem>>, vector<1x128xf32>
    %5 = vector.broadcast %4 : vector<1x128xf32> to vector<8x128xf32>
    %6 = arith.addf %3, %5 : vector<8x128xf32>
    %cst_5 = arith.constant 0.000000e+00 : f32
    %7 = vector.broadcast %cst_5 : f32 to vector<8x128xf32>
    %8 = arith.maximumf %6, %7 : vector<8x128xf32>
    %9 = arith.truncf %8 : vector<8x128xf32> to vector<8x128xbf16>
    %c0_6 = arith.constant 0 : index
    %c0_7 = arith.constant 0 : index
    %10 = vector.load %arg3[%c0_6, %c0_7] : memref<128x256xbf16, #tpu.memory_space<vmem>>, vector<128x256xbf16>
    %cst_8 = arith.constant dense<0.000000e+00> : vector<8x256xf32>
    %11 = tpu.matmul %9, %10, %cst_8 {dimension_numbers = #tpu.dot_dimension_numbers<[1], [0], [0], [1], [0, 0, 1, 1], [], []>} : vector<8x128xbf16>, vector<128x256xbf16>, vector<8x256xf32> -> vector<8x256xf32>
    %c0_9 = arith.constant 0 : index
    %c0_10 = arith.constant 0 : index
    %12 = vector.load %arg4[%c0_9, %c0_10] : memref<1x256xf32, #tpu.memory_space<vmem>>, vector<1x256xf32>
    %13 = vector.broadcast %12 : vector<1x256xf32> to vector<8x256xf32>
    %14 = arith.addf %11, %13 : vector<8x256xf32>
    %15 = vector.extract_strided_slice %14 {offsets = [0, 0], sizes = [8, 128], strides = [1, 1]} : vector<8x256xf32> to vector<8x128xf32>
    %16 = vector.extract_strided_slice %14 {offsets = [0, 128], sizes = [8, 128], strides = [1, 1]} : vector<8x256xf32> to vector<8x128xf32>
    %cst_11 = arith.constant 5.000000e-01 : f32
    %17 = vector.broadcast %cst_11 : f32 to vector<8x128xf32>
    %18 = arith.mulf %17, %16 : vector<8x128xf32>
    %19 = math.exp %18 : vector<8x128xf32>
    %c0_12 = arith.constant 0 : index
    %c0_13 = arith.constant 0 : index
    %20 = vector.load %arg6[%c0_12, %c0_13] : memref<8x384xf32, #tpu.memory_space<vmem>>, vector<8x128xf32>
    tpu.vector_store %arg6[%c0_12, %c0_13], %15 {strides = array<i32>} : memref<8x384xf32, #tpu.memory_space<vmem>>, vector<8x128xf32>,
    %c0_14 = arith.constant 0 : index
    %c128 = arith.constant 128 : index
    %21 = vector.load %arg6[%c0_14, %c128] : memref<8x384xf32, #tpu.memory_space<vmem>>, vector<8x128xf32>
    tpu.vector_store %arg6[%c0_14, %c128], %16 {strides = array<i32>} : memref<8x384xf32, #tpu.memory_space<vmem>>, vector<8x128xf32>,
    %c0_15 = arith.constant 0 : index
    %c256 = arith.constant 256 : index
    %22 = vector.load %arg6[%c0_15, %c256] : memref<8x384xf32, #tpu.memory_space<vmem>>, vector<8x128xf32>
    tpu.vector_store %arg6[%c0_15, %c256], %19 {strides = array<i32>} : memref<8x384xf32, #tpu.memory_space<vmem>>, vector<8x128xf32>,
    %23 = vector.shape_cast %15 : vector<8x128xf32> to vector<1x8x128xf32>
    %24 = vector.shape_cast %19 : vector<8x128xf32> to vector<1x8x128xf32>
    %c0_16 = arith.constant 0 : index
    %c0_17 = arith.constant 0 : index
    %c0_18 = arith.constant 0 : index
    %25 = vector.load %arg5[%c0_16, %c0_17, %c0_18] : memref<6x8x128xf32, #tpu.memory_space<vmem>>, vector<6x8x128xf32>
    %26 = vector.broadcast %24 : vector<1x8x128xf32> to vector<6x8x128xf32>
    %27 = arith.mulf %26, %25 : vector<6x8x128xf32>
    %28 = vector.broadcast %23 : vector<1x8x128xf32> to vector<6x8x128xf32>
    %29 = arith.addf %28, %27 : vector<6x8x128xf32>
    %c0_19 = arith.constant 0 : index
    %c0_20 = arith.constant 0 : index
    %c0_21 = arith.constant 0 : index
    %30 = vector.load %arg7[%c0_19, %c0_20, %c0_21] : memref<6x8x128xf32, #tpu.memory_space<vmem>>, vector<6x8x128xf32>
    tpu.vector_store %arg7[%c0_19, %c0_20, %c0_21], %29 {strides = array<i32>} : memref<6x8x128xf32, #tpu.memory_space<vmem>>, vector<6x8x128xf32>,
    return
  }
}

</mosaic_0001>

<bundles_post_ra>
// kernel: tpu_custom_call.1
= control target key start
LH: loop header
LB: loop body
LE: loop exit
PB: predicated region body
PF: predicated region fallthrough
CT: control target
= control target key end

     0   :  { %13 = vsyncpa [#allocation3], 0  ;;  %s1540_s0 = inlined_call_operand.hbm [shape: f32[8,1024], index: 0, kind: input, shape index: {}]   ;;  %s1541_s1 = inlined_call_operand.hbm [shape: bf16[1024,128], index: 1, kind: input, shape index: {}]   ;;  %s1542_s2 = inlined_call_operand.vmem [shape: f32[1,128], index: 2, kind: input, shape index: {}]   ;;  %s1543_s3 = inlined_call_operand.hbm [shape: bf16[128,256], index: 3, kind: input, shape index: {}]   ;;  %s1544_s4 = inlined_call_operand.vmem [shape: f32[1,256], index: 4, kind: input, shape index: {}]   ;;  %s1545_s5 = inlined_call_operand.hbm [shape: f32[6,8,128], index: 5, kind: input, shape index: {}]   ;;  %s1546_s6 = inlined_call_operand.hbm [shape: f32[8,384], index: 6, kind: output, shape index: {0}]   ;;  %s1547_s7 = inlined_call_operand.hbm [shape: f32[6,8,128], index: 7, kind: output, shape index: {1}]  }
   0x1   :  { %14 = vsyncpa [#allocation6], 0 }
   0x2   :  { %15 = vsyncpa [#allocation9], 0 }
   0x3   :  { %16 = vsyncpa [#allocation4], 0 }
   0x4   :  { %17 = vsyncpa [#allocation12], 0  ;;  %s1402_s24 = smov [#allocation5]   ;;  %s1260_s28 = scalar_lea.hbm %s1541_s1, 8192 }
   0x5   :  { %s33_s25 = sshll.u32 %s1402_s24, 4  ;;  %p1261_p0 = scmp.ne.s32.totalorder %s1541_s1, %s1260_s28  ;;  %s34_s25 = int_to_ptr.vmem [resolvable:$true] %s33_s25 }
   0x6   :  { %p1264_p1 = scmp.lt.u32.totalorder %s1260_s28, %s1541_s1 }
   0x8   :  { %p1266_p2 = pnand %p1264_p1, %p1261_p0 }
   0xa   :  { %1269 = shalt.err (!%p1266_p2)
}
   0xb   :  { %s1270_s10 = scalar_lea.vmem %s34_s25, 8192  ;;  %p1275_p4 = scmp.lt.s32.totalorder %s34_s25, %s34_s25 }
   0xc   :  { %p1271_p3 = scmp.ne.s32.totalorder %s34_s25, %s1270_s10  ;;  %p1276_p5 = scmp.lt.s32.totalorder %s1270_s10, %s1270_s10 }
   0xe   :  { %p1277_p6 = por %p1276_p5, %p1275_p4 }
  0x10   :  { %p1278_p7 = pnand %p1277_p6, %p1271_p3 }
  0x12   :  { %1281 = shalt.err (!%p1278_p7)
}
  0x13   :  { %s1403_s11 = smov 64   ;;  %s1404_s12 = smov 4  }
  0x14   :  { %39 = dma.hbm_to_vmem [thread:$0]  %s1541_s1, 8192, %s34_s25, [#allocation6], %s1403_s11, %s1403_s11, %s1404_s12  }
  0x15   :  { %s1405_s15 = smov [#allocation2]   ;;  %s1406_s17 = smov [#allocation7]  }
  0x16   :  { %s24_s16 = sshll.u32 %s1405_s15, 4  ;;  %s47_s18 = sshll.u32 %s1406_s17, 4  ;;  %s25_s16 = int_to_ptr.vmem [resolvable:$true] %s24_s16  ;;  %s48_s18 = int_to_ptr.vmem [resolvable:$true] %s47_s18 }
  0x17   :  { %s1282_s21 = scalar_lea.hbm %s1540_s0, 1024 }
  0x18   :  { %p1283_p8 = scmp.ne.s32.totalorder %s1540_s0, %s1282_s21  ;;  %p1286_p9 = scmp.lt.u32.totalorder %s1282_s21, %s1540_s0 }
  0x1a   :  { %p1288_p10 = pnand %p1286_p9, %p1283_p8 }
  0x1c   :  { %1291 = shalt.err (!%p1288_p10)
}
  0x1d   :  { %s1292_s1 = scalar_lea.vmem %s25_s16, 1024  ;;  %p1297_p12 = scmp.lt.s32.totalorder %s25_s16, %s25_s16 }
  0x1e   :  { %p1293_p11 = scmp.ne.s32.totalorder %s25_s16, %s1292_s1  ;;  %p1298_p13 = scmp.lt.s32.totalorder %s1292_s1, %s1292_s1 }
  0x20   :  { %p1299_p0 = por %p1298_p13, %p1297_p12 }
  0x22   :  { %p1300_p1 = pnand %p1299_p0, %p1293_p11 }
  0x24   :  { %1303 = shalt.err (!%p1300_p1)
}
  0x25   :  { %27 = dma.hbm_to_vmem [thread:$0]  %s1540_s0, 1024, %s25_s16, [#allocation3]  }
  0x26   :  { %s1304_s30 = scalar_lea.hbm %s1543_s3, 2048 }
  0x27   :  { %p1305_p2 = scmp.ne.s32.totalorder %s1543_s3, %s1304_s30  ;;  %p1308_p3 = scmp.lt.u32.totalorder %s1304_s30, %s1543_s3 }
  0x29   :  { %p1310_p4 = pnand %p1308_p3, %p1305_p2 }
  0x2b   :  { %1313 = shalt.err (!%p1310_p4)
}
  0x2c   :  { %s1314_s12 = scalar_lea.vmem %s48_s18, 2048  ;;  %p1319_p6 = scmp.lt.s32.totalorder %s48_s18, %s48_s18 }
  0x2d   :  { %p1315_p5 = scmp.ne.s32.totalorder %s48_s18, %s1314_s12  ;;  %p1320_p7 = scmp.lt.s32.totalorder %s1314_s12, %s1314_s12 }
  0x2f   :  { %p1321_p8 = por %p1320_p7, %p1319_p6 }
  0x31   :  { %p1322_p9 = pnand %p1321_p8, %p1315_p5 }
  0x33   :  { %1325 = shalt.err (!%p1322_p9)
}
  0x34   :  { %s1407_s0 = smov 128   ;;  %s1408_s13 = smov 8  }
  0x35   :  { %53 = dma.hbm_to_vmem [thread:$0]  %s1543_s3, 2048, %s48_s18, [#allocation6], %s1407_s0, %s1407_s0, %s1408_s13  }
  0x36   :  { %s1409_s16 = smov [#allocation8]   ;;  %s1326_s21 = scalar_lea.hbm %s1545_s5, 768 }
  0x37   :  { %s61_s17 = sshll.u32 %s1409_s16, 4  ;;  %p1327_p10 = scmp.ne.s32.totalorder %s1545_s5, %s1326_s21  ;;  %s62_s17 = int_to_ptr.vmem [resolvable:$true] %s61_s17 }
  0x38   :  { %p1330_p11 = scmp.lt.u32.totalorder %s1326_s21, %s1545_s5 }
  0x3a   :  { %p1332_p12 = pnand %p1330_p11, %p1327_p10 }
  0x3c   :  { %1335 = shalt.err (!%p1332_p12)
}
  0x3d   :  { %s1336_s1 = scalar_lea.vmem %s62_s17, 768  ;;  %p1341_p0 = scmp.lt.s32.totalorder %s62_s17, %s62_s17 }
  0x3e   :  { %p1337_p13 = scmp.ne.s32.totalorder %s62_s17, %s1336_s1  ;;  %p1342_p1 = scmp.lt.s32.totalorder %s1336_s1, %s1336_s1 }
  0x40   :  { %p1343_p2 = por %p1342_p1, %p1341_p0 }
  0x42   :  { %p1344_p3 = pnand %p1343_p2, %p1337_p13 }
  0x44   :  { %1347 = shalt.err (!%p1344_p3)
}
  0x45   :  { %67 = dma.hbm_to_vmem [thread:$0]  %s1545_s5, 768, %s62_s17, [#allocation9], %s1407_s0, %s1407_s0, %s1408_s13  }
  0x46   :  { %1392 = dma.done.wait [#allocation3], 1024  }
  0x47   :  { %1393 = vsyncadd [#allocation3], 4294966272 }
  0x48   :  { %1394 = dma.done.wait [#allocation6], 10240  }
  0x49   :  { %1395 = vsyncadd [#allocation6], 4294957056 }
  0x4a   :  { %1396 = dma.done.wait [#allocation9], 768  }
  0x4b   :  { %1397 = vsyncadd [#allocation9], 4294966528  ;;  %v1170_v0 = vld [vmem:[#allocation5 + $0x40] sm:$0xff]   ;;  %v1174_v4 = vld [vmem:[#allocation5 + $0x48] sm:$0xff]   ;;  %s1411_s28 = smov [#allocation10]  }
  0x4c   :  { %v1171_v1 = vld [vmem:[#allocation5 + $0xc0] sm:$0xff]   ;;  %1071 = vmatprep.subr.bf16.mxu0 %v1170_v0  ;;  %v1175_v5 = vld [vmem:[#allocation5 + $0xc8] sm:$0xff]   ;;  %v1178_v8 = vld [vmem:[#allocation5 + $0x50] sm:$0xff]   ;;  %s963_s29 = sshll.u32 %s1411_s28, 4  ;;  %s964_s29 = int_to_ptr.vmem [resolvable:$true] %s963_s29 }
  0x4d   :  { %v1172_v2 = vld [vmem:[#allocation5] sm:$0xff]   ;;  %1093 = vmatprep.subr.bf16.mxu1 %v1171_v1  ;;  %v1176_v6 = vld [vmem:[#allocation5 + $0x8] sm:$0xff]   ;;  %v1179_v9 = vld [vmem:[#allocation5 + $0xd0] sm:$0xff]   ;;  %s1348_s8 = scalar_lea.vmem %s964_s29, 384  ;;  %p1353_p5 = scmp.lt.s32.totalorder %s964_s29, %s964_s29 }
  0x4e   :  { %v1173_v3 = vld [vmem:[#allocation5 + $0x80] sm:$0xff]   ;;  %1072 = vmatpush3.bf16.msra.mxu0 %v1172_v2  ;;  %v1177_v7 = vld [vmem:[#allocation5 + $0x88] sm:$0xff]   ;;  %v1180_v10 = vld [vmem:[#allocation5 + $0x10] sm:$0xff]   ;;  %p1349_p4 = scmp.ne.s32.totalorder %s964_s29, %s1348_s8  ;;  %p1354_p6 = scmp.lt.s32.totalorder %s1348_s8, %s1348_s8 }
  0x4f   :  { %1094 = vmatpush3.bf16.msra.mxu1 %v1173_v3  ;;  %1073 = vmatprep.subr.bf16.mxu0 %v1174_v4  ;;  %v1181_v11 = vld [vmem:[#allocation5 + $0x90] sm:$0xff]   ;;  %v1182_v12 = vld [vmem:[#allocation5 + $0x58] sm:$0xff]   ;;  %v1186_v16 = vld [vmem:[#allocation5 + $0x60] sm:$0xff]  }
  0x50   :  { %1095 = vmatprep.subr.bf16.mxu1 %v1175_v5  ;;  %v1183_v13 = vld [vmem:[#allocation5 + $0xd8] sm:$0xff]   ;;  %v1187_v17 = vld [vmem:[#allocation5 + $0xe0] sm:$0xff]   ;;  %v1190_v20 = vld [vmem:[#allocation5 + $0x68] sm:$0xff]   ;;  %p1355_p7 = por %p1354_p6, %p1353_p5 }
  0x51   :  { %v1184_v14 = vld [vmem:[#allocation5 + $0x18] sm:$0xff]   ;;  %v1188_v18 = vld [vmem:[#allocation5 + $0x20] sm:$0xff]   ;;  %v1191_v21 = vld [vmem:[#allocation5 + $0xe8] sm:$0xff]  }
  0x52   :  { %1074 = vmatpush3.bf16.msra.mxu0 %v1176_v6  ;;  %v1185_v15 = vld [vmem:[#allocation5 + $0x98] sm:$0xff]   ;;  %v1189_v19 = vld [vmem:[#allocation5 + $0xa0] sm:$0xff]   ;;  %v1192_v22 = vld [vmem:[#allocation5 + $0x28] sm:$0xff]   ;;  %p1356_p8 = pnand %p1355_p7, %p1349_p4 }
  0x53   :  { %1096 = vmatpush3.bf16.msra.mxu1 %v1177_v7  ;;  %1075 = vmatprep.subr.bf16.mxu0 %v1178_v8  ;;  %v1193_v23 = vld [vmem:[#allocation5 + $0xa8] sm:$0xff]   ;;  %v1194_v24 = vld [vmem:[#allocation5 + $0x70] sm:$0xff]   ;;  %v1198_v28 = vld [vmem:[#allocation5 + $0x78] sm:$0xff]  }
  0x54   :  { %1097 = vmatprep.subr.bf16.mxu1 %v1179_v9  ;;  %v1195_v25 = vld [vmem:[#allocation5 + $0xf0] sm:$0xff]   ;;  %v1199_v29 = vld [vmem:[#allocation5 + $0xf8] sm:$0xff]   ;;  %v82_v32 = vld [vmem:[#allocation2 + $0x8] sm:$0xff] }
  0x55   :  { %v1196_v26 = vld [vmem:[#allocation5 + $0x30] sm:$0xff]   ;;  %v1200_v30 = vld [vmem:[#allocation5 + $0x38] sm:$0xff]   ;;  %v81_v34 = vld [vmem:[#allocation2] sm:$0xff]  ;;  %v90_v35 = vpack.c.bf16 %v82_v32, %v82_v32  ;;  %v1410_v32 = vmov 0  }
  0x56   :  { %1076 = vmatpush3.bf16.msra.mxu0 %v1180_v10  ;;  %v1197_v27 = vld [vmem:[#allocation5 + $0xb0] sm:$0xff]   ;;  %v1201_v31 = vld [vmem:[#allocation5 + $0xb8] sm:$0xff]   ;;  %v89_v37 = vpack.c.bf16 %v81_v34, %v81_v34  ;;  %v1202_v40 = vld [vmem:[#allocation5 + $0x140] sm:$0xff]  }
  0x57   :  { %1098 = vmatpush3.bf16.msra.mxu1 %v1181_v11  ;;  %1077 = vmatprep.subr.bf16.mxu0 %v1182_v12  ;;  %v84_v33 = vld [vmem:[#allocation2 + $0x18] sm:$0xff]  ;;  %v83_v38 = vld [vmem:[#allocation2 + $0x10] sm:$0xff]  ;;  %v1203_v41 = vld [vmem:[#allocation5 + $0x1c0] sm:$0xff]  }
  0x58   :  { %1099 = vmatprep.subr.bf16.mxu1 %v1183_v13  ;;  %v92_v36 = vpack.c.bf16 %v84_v33, %v84_v33  ;;  %v91_v39 = vpack.c.bf16 %v83_v38, %v83_v38  ;;  %648 = vmatprep.mubr.bf16.mxu0 %v90_v35  ;;  %v1204_v42 = vld [vmem:[#allocation5 + $0x100] sm:$0xff]   ;;  %v1206_v44 = vld [vmem:[#allocation5 + $0x148] sm:$0xff]   ;;  %v1210_v48 = vld [vmem:[#allocation5 + $0x150] sm:$0xff]  }
  0x59   :  { %v1205_v43 = vld [vmem:[#allocation5 + $0x180] sm:$0xff]   ;;  %v1207_v45 = vld [vmem:[#allocation5 + $0x1c8] sm:$0xff]   ;;  %v1211_v49 = vld [vmem:[#allocation5 + $0x1d0] sm:$0xff]  }
  0x5a   :  { %1078 = vmatpush3.bf16.msra.mxu0 %v1184_v14  ;;  %688 = vmatprep.mubr.bf16.mxu1 %v92_v36  ;;  %v1208_v46 = vld [vmem:[#allocation5 + $0x108] sm:$0xff]   ;;  %v1212_v50 = vld [vmem:[#allocation5 + $0x110] sm:$0xff]   ;;  %v1214_v52 = vld [vmem:[#allocation5 + $0x158] sm:$0xff]  }
  0x5b   :  { %1100 = vmatpush3.bf16.msra.mxu1 %v1185_v15  ;;  %1079 = vmatprep.subr.bf16.mxu0 %v1186_v16  ;;  %v1209_v47 = vld [vmem:[#allocation5 + $0x188] sm:$0xff]   ;;  %v1213_v51 = vld [vmem:[#allocation5 + $0x190] sm:$0xff]   ;;  %v1215_v53 = vld [vmem:[#allocation5 + $0x1d8] sm:$0xff]  }
  0x5c   :  { %1101 = vmatprep.subr.bf16.mxu1 %v1187_v17  ;;  %v1216_v54 = vld [vmem:[#allocation5 + $0x118] sm:$0xff]   ;;  %v1218_v56 = vld [vmem:[#allocation5 + $0x160] sm:$0xff]   ;;  %v1222_v60 = vld [vmem:[#allocation5 + $0x168] sm:$0xff]  }
  0x5d   :  { %v1217_v55 = vld [vmem:[#allocation5 + $0x198] sm:$0xff]   ;;  %v1219_v57 = vld [vmem:[#allocation5 + $0x1e0] sm:$0xff]   ;;  %v1223_v61 = vld [vmem:[#allocation5 + $0x1e8] sm:$0xff]  }
  0x5e   :  { %1080 = vmatpush3.bf16.msra.mxu0 %v1188_v18  ;;  %v1220_v58 = vld [vmem:[#allocation5 + $0x120] sm:$0xff]   ;;  %v1224_v62 = vld [vmem:[#allocation5 + $0x128] sm:$0xff]   ;;  %v1226_v0 = vld [vmem:[#allocation5 + $0x170] sm:$0xff]  }
  0x5f   :  { %1102 = vmatpush3.bf16.msra.mxu1 %v1189_v19  ;;  %1081 = vmatprep.subr.bf16.mxu0 %v1190_v20  ;;  %v1221_v59 = vld [vmem:[#allocation5 + $0x1a0] sm:$0xff]   ;;  %v1225_v63 = vld [vmem:[#allocation5 + $0x1a8] sm:$0xff]   ;;  %v1227_v1 = vld [vmem:[#allocation5 + $0x1f0] sm:$0xff]  }
  0x60   :  { %1103 = vmatprep.subr.bf16.mxu1 %v1191_v21  ;;  %v1228_v2 = vld [vmem:[#allocation5 + $0x130] sm:$0xff]   ;;  %v1230_v4 = vld [vmem:[#allocation5 + $0x178] sm:$0xff]   ;;  %v86_v8 = vld [vmem:[#allocation2 + $0x28] sm:$0xff] }
  0x61   :  { %v1229_v3 = vld [vmem:[#allocation5 + $0x1b0] sm:$0xff]   ;;  %v1231_v5 = vld [vmem:[#allocation5 + $0x1f8] sm:$0xff]   ;;  %v94_v10 = vpack.c.bf16 %v86_v8, %v86_v8  ;;  %v85_v12 = vld [vmem:[#allocation2 + $0x20] sm:$0xff] }
  0x62   :  { %1082 = vmatpush3.bf16.msra.mxu0 %v1192_v22  ;;  %v1232_v6 = vld [vmem:[#allocation5 + $0x138] sm:$0xff]   ;;  %v87_v13 = vld [vmem:[#allocation2 + $0x30] sm:$0xff]  ;;  %v93_v14 = vpack.c.bf16 %v85_v12, %v85_v12  ;;  %v1234_v16 = vld [vmem:[#allocation7] ss:$8 sps:$4 sm:$0xff]  }
  0x63   :  { %1104 = vmatpush3.bf16.msra.mxu1 %v1193_v23  ;;  %1083 = vmatprep.subr.bf16.mxu0 %v1194_v24  ;;  %v1233_v7 = vld [vmem:[#allocation5 + $0x1b8] sm:$0xff]   ;;  %v95_v15 = vpack.c.bf16 %v87_v13, %v87_v13  ;;  %v1236_v17 = vld [vmem:[#allocation7 + $0x4] ss:$8 sps:$4 sm:$0xff]   ;;  %v1240_v21 = vld [vmem:[#allocation7 + $0x20] ss:$8 sps:$4 sm:$0xff]  }
  0x64   :  { %1105 = vmatprep.subr.bf16.mxu1 %v1195_v25  ;;  %v88_v9 = vld [vmem:[#allocation2 + $0x38] sm:$0xff]  ;;  %v1242_v20 = vld [vmem:[#allocation7 + $0x24] ss:$8 sps:$4 sm:$0xff]   ;;  %v1246_v25 = vld [vmem:[#allocation7 + $0x40] ss:$8 sps:$4 sm:$0xff]  }
  0x65   :  { %v96_v11 = vpack.c.bf16 %v88_v9, %v88_v9  ;;  %v1239_v18 = vld [vmem:[#allocation7 + $0x14] ss:$8 sps:$4 sm:$0xff]   ;;  %v1237_v19 = vld [vmem:[#allocation7 + $0x10] ss:$8 sps:$4 sm:$0xff]   ;;  %v1248_v24 = vld [vmem:[#allocation7 + $0x44] ss:$8 sps:$4 sm:$0xff]  }
  0x66   :  { %1084 = vmatpush3.bf16.msra.mxu0 %v1196_v26  ;;  %v1245_v22 = vld [vmem:[#allocation7 + $0x34] ss:$8 sps:$4 sm:$0xff]   ;;  %v1243_v23 = vld [vmem:[#allocation7 + $0x30] ss:$8 sps:$4 sm:$0xff]   ;;  %v990_v35 = vld [vmem:[%s1542_s2] ss:$0 sm:$0xff] }
  0x67   :  { %1106 = vmatpush3.bf16.msra.mxu1 %v1197_v27  ;;  %1085 = vmatprep.subr.bf16.mxu0 %v1198_v28  ;;  %v1251_v26 = vld [vmem:[#allocation7 + $0x54] ss:$8 sps:$4 sm:$0xff]   ;;  %v1249_v27 = vld [vmem:[#allocation7 + $0x50] ss:$8 sps:$4 sm:$0xff]   ;;  %v1254_v28 = vld [vmem:[#allocation7 + $0x64] ss:$8 sps:$4 sm:$0xff]  }
  0x68   :  { %1107 = vmatprep.subr.bf16.mxu1 %v1199_v29  ;;  %v1252_v29 = vld [vmem:[#allocation7 + $0x60] ss:$8 sps:$4 sm:$0xff]   ;;  %v935_v13 = vld [vmem:[#allocation8 + $0x10] sm:$0xff] }
  0x69   :  { %v934_v12 = vld [vmem:[#allocation8 + $0x8] sm:$0xff] }
  0x6a   :  { %1086 = vmatpush3.bf16.msra.mxu0 %v1200_v30  ;;  %v1257_v30 = vld [vmem:[#allocation7 + $0x74] ss:$8 sps:$4 sm:$0xff]  }
  0x6b   :  { %1108 = vmatpush3.bf16.msra.mxu1 %v1201_v31  ;;  %1115 = vmatprep.subr.bf16.mxu0 %v1202_v40  ;;  %v1255_v31 = vld [vmem:[#allocation7 + $0x70] ss:$8 sps:$4 sm:$0xff]  }
  0x6c   :  { %1137 = vmatprep.subr.bf16.mxu1 %v1203_v41 }
  0x6d   :  { %649 = vmatmul.mubr.bf16.vlgmr.msra.gmra.mrb[0].mxu0 %v89_v37 }
  0x6e   :  { %689 = vmatmul.mubr.bf16.vlgmr.msra.gmra.mrb[0].mxu1 %v91_v39  ;;  %1116 = vmatpush3.bf16.msra.mxu0 %v1204_v42 }
  0x6f   :  { %1138 = vmatpush3.bf16.msra.mxu1 %v1205_v43  ;;  %1117 = vmatprep.subr.bf16.mxu0 %v1206_v44 }
  0x70   :  { %1139 = vmatprep.subr.bf16.mxu1 %v1207_v45  ;;  %728 = vmatprep.mubr.bf16.mxu0 %v94_v10 }
  0x71   :  { %768 = vmatprep.mubr.bf16.mxu1 %v96_v11  ;;  %v933_v11 = vld [vmem:[#allocation8] sm:$0xff] }
  0x72   :  { %1118 = vmatpush3.bf16.msra.mxu0 %v1208_v46 }
  0x73   :  { %1140 = vmatpush3.bf16.msra.mxu1 %v1209_v47  ;;  %1119 = vmatprep.subr.bf16.mxu0 %v1210_v48 }
  0x74   :  { %1141 = vmatprep.subr.bf16.mxu1 %v1211_v49 }
  0x76   :  { %1120 = vmatpush3.bf16.msra.mxu0 %v1212_v50 }
  0x77   :  { %1142 = vmatpush3.bf16.msra.mxu1 %v1213_v51  ;;  %1121 = vmatprep.subr.bf16.mxu0 %v1214_v52 }
  0x78   :  { %1143 = vmatprep.subr.bf16.mxu1 %v1215_v53 }
  0x7a   :  { %1122 = vmatpush3.bf16.msra.mxu0 %v1216_v54 }
  0x7b   :  { %1144 = vmatpush3.bf16.msra.mxu1 %v1217_v55  ;;  %1123 = vmatprep.subr.bf16.mxu0 %v1218_v56 }
  0x7c   :  { %1145 = vmatprep.subr.bf16.mxu1 %v1219_v57 }
  0x7e   :  { %1124 = vmatpush3.bf16.msra.mxu0 %v1220_v58 }
  0x7f   :  { %1146 = vmatpush3.bf16.msra.mxu1 %v1221_v59  ;;  %1125 = vmatprep.subr.bf16.mxu0 %v1222_v60  ;;  %v796_v60 = vlaneseq }
  0x80   :  { %1147 = vmatprep.subr.bf16.mxu1 %v1223_v61 }
  0x81   :  { %v797_v61 = vshrl.u32 %v796_v60, 7 }
  0x82   :  { %1126 = vmatpush3.bf16.msra.mxu0 %v1224_v62 }
  0x83   :  { %1148 = vmatpush3.bf16.msra.mxu1 %v1225_v63  ;;  %1127 = vmatprep.subr.bf16.mxu0 %v1226_v0  ;;  %v798_v62 = vsub.s32 0, %v797_v61  ;;  %v794_v63 = vld [vmem:[%s1544_s4] sm:$0x3]  ;;  %v802_v0 = vsub.s32 1, %v797_v61  ;;  %s1412_s4 = smov [#allocation11]  }
  0x84   :  { %1149 = vmatprep.subr.bf16.mxu1 %v1227_v1  ;;  %s972_s30 = sshll.u32 %s1412_s4, 4  ;;  %s973_s30 = int_to_ptr.vmem [resolvable:$true] %s972_s30 }
  0x85   :  { %v799_v1 = vrot.slane %v794_v63, %v798_v62 }
  0x86   :  { %1128 = vmatpush3.bf16.msra.mxu0 %v1228_v2  ;;  %v803_v2 = vrot.slane %v794_v63, %v802_v0 }
  0x87   :  { %1150 = vmatpush3.bf16.msra.mxu1 %v1229_v3  ;;  %1129 = vmatprep.subr.bf16.mxu0 %v1230_v4 }
  0x88   :  { %1151 = vmatprep.subr.bf16.mxu1 %v1231_v5 }
  0x8a   :  { %1130 = vmatpush3.bf16.msra.mxu0 %v1232_v6 }
  0x8b   :  { %1152 = vmatpush3.bf16.msra.mxu1 %v1233_v7  ;;  %886 = vmatprep.subr.bf16.mxu0 %v1236_v17 }
  0x8d   :  { %729 = vmatmul.mubr.bf16.vlgmr.msra.gmra.mrb[4].mxu0 %v93_v14  ;;  %v936_v14 = vld [vmem:[#allocation8 + $0x18] sm:$0xff] }
  0x8e   :  { %769 = vmatmul.mubr.bf16.vlgmr.msra.gmra.mrb[4].mxu1 %v95_v15  ;;  %887 = vmatpush1.bf16.msra.mxu0 %v1234_v16  ;;  %v937_v15 = vld [vmem:[#allocation8 + $0x20] sm:$0xff]  ;;  %v938_v16 = vld [vmem:[#allocation8 + $0x28] sm:$0xff] }
  0x8f   :  { %888 = vmatprep.subr.bf16.mxu0 %v1239_v18  ;;  %918 = vmatprep.mubr.bf16.mxu0 %v1410_v32 }
  0x92   :  { %889 = vmatpush1.bf16.msra.mxu0 %v1237_v19 }
  0x93   :  { %890 = vmatprep.subr.bf16.mxu0 %v1242_v20 }
  0x96   :  { %891 = vmatpush1.bf16.msra.mxu0 %v1240_v21 }
  0x97   :  { %892 = vmatprep.subr.bf16.mxu0 %v1245_v22 }
  0x9a   :  { %893 = vmatpush1.bf16.msra.mxu0 %v1243_v23 }
  0x9b   :  { %894 = vmatprep.subr.bf16.mxu0 %v1248_v24 }
  0x9e   :  { %895 = vmatpush1.bf16.msra.mxu0 %v1246_v25 }
  0x9f   :  { %896 = vmatprep.subr.bf16.mxu0 %v1251_v26 }
  0xa2   :  { %897 = vmatpush1.bf16.msra.mxu0 %v1249_v27 }
  0xa3   :  { %898 = vmatprep.subr.bf16.mxu0 %v1254_v28 }
  0xa6   :  { %899 = vmatpush1.bf16.msra.mxu0 %v1252_v29 }
  0xa7   :  { %900 = vmatprep.subr.bf16.mxu0 %v1257_v30 }
  0xaa   :  { %901 = vmatpush1.bf16.msra.mxu0 %v1255_v31 }
 0x140   :  { %v1087_v33 = vpop.f32.mrb[0].mxu0 }
 0x141   :  { %v1109_v34 = vpop.f32.mrb[0].mxu1  ;;  %v1088_v36 = vpop.f32.mrb[1].mxu0 }
 0x142   :  { %v1110_v37 = vpop.f32.mrb[1].mxu1  ;;  %v1089_v38 = vadd.f32 %v1088_v36, %v1087_v33  ;;  %v1090_v40 = vpop.f32.mrb[2].mxu0 }
 0x143   :  { %v1111_v39 = vadd.f32 %v1110_v37, %v1109_v34  ;;  %v1112_v41 = vpop.f32.mrb[2].mxu1  ;;  %v1091_v42 = vpop.f32.mrb[3].mxu0 }
 0x144   :  { %v1113_v43 = vpop.f32.mrb[3].mxu1  ;;  %v651_v44 = vadd.f32 %v1089_v38, %v990_v35 }
 0x146   :  { %v691_v45 = vadd.f32 %v1111_v39, %v651_v44 }
 0x160   :  { %v1131_v46 = vpop.f32.mrb[4].mxu0 }
 0x161   :  { %v1153_v47 = vpop.f32.mrb[4].mxu1  ;;  %v1132_v48 = vpop.f32.mrb[5].mxu0 }
 0x162   :  { %v1133_v49 = vadd.f32 %v1132_v48, %v1131_v46  ;;  %v1154_v50 = vpop.f32.mrb[5].mxu1  ;;  %v1134_v51 = vpop.f32.mrb[6].mxu0 }
 0x163   :  { %v1155_v52 = vadd.f32 %v1154_v50, %v1153_v47  ;;  %v1156_v53 = vpop.f32.mrb[6].mxu1  ;;  %v1135_v54 = vpop.f32.mrb[7].mxu0 }
 0x164   :  { %v731_v55 = vadd.f32 %v1133_v49, %v691_v45  ;;  %v1157_v56 = vpop.f32.mrb[7].mxu1 }
 0x166   :  { %v771_v57 = vadd.f32 %v1155_v52, %v731_v55 }
 0x168   :  { %v776_v58 = vmax.f32 %v771_v57, 0.0 }
 0x16a   :  { %v777_v59 = vpack.c.bf16 %v776_v58, %v776_v58 }
 0x16c   :  { %919 = vmatmul.mubr.bf16.vlgmr.msra.gmra.mrb[8].mxu0 %v777_v59 }
 0x23f   :  { %v920_v3 = vpop.f32.mrb[8].mxu0 }
 0x240   :  { %v921_v4 = vadd.f32 %v920_v3, %v799_v1  ;;  %v922_v5 = vpop.f32.mrb[9].mxu0 }
 0x241   :  { %v923_v6 = vadd.f32 %v922_v5, %v803_v2  ;;  %v924_v7 = vpop.f32.mrb[10].mxu0 }
 0x242   :  { %930 = vst [vmem:[#allocation10] sm:$0xff] %v921_v4  ;;  %v925_v8 = vpop.f32.mrb[11].mxu0 }
 0x243   :  { %v927_v9 = vmul.f32 0.5, %v923_v6  ;;  %931 = vst [vmem:[#allocation10 + $0x8] sm:$0xff] %v923_v6 }
 0x245   :  { %v928_v10 = vmul.f32 1.442695, %v927_v9 }
 0x247   :  { %1258 = vpow2.f32 %v928_v10 }
 0x251   :  { %v1259_v17 = vpop.eup %1258 }
 0x252   :  { %932 = vst [vmem:[#allocation10 + $0x10] sm:$0xff] %v1259_v17  ;;  %v939_v18 = vmul.f32 %v1259_v17, %v933_v11  ;;  %v940_v19 = vmul.f32 %v1259_v17, %v934_v12  ;;  %v941_v20 = vmul.f32 %v1259_v17, %v935_v13  ;;  %v942_v21 = vmul.f32 %v1259_v17, %v936_v14 }
 0x253   :  { %1359 = shalt.err (!%p1356_p8)
}
 0x254   :  { %s1360_s11 = scalar_lea.hbm %s1546_s6, 384 }
 0x255   :  { %p1361_p9 = scmp.ne.s32.totalorder %s1546_s6, %s1360_s11  ;;  %p1364_p10 = scmp.lt.u32.totalorder %s1360_s11, %s1546_s6 }
 0x257   :  { %p1366_p11 = pnand %p1364_p10, %p1361_p9 }
 0x259   :  { %1369 = shalt.err (!%p1366_p11)
}
 0x25a   :  { %966 = dma.vmem_to_hbm [thread:$0]  %s964_s29, 384, %s1546_s6, [#allocation4]   ;;  %v943_v22 = vmul.f32 %v1259_v17, %v937_v15  ;;  %v944_v23 = vmul.f32 %v1259_v17, %v938_v16  ;;  %v945_v24 = vadd.f32 %v939_v18, %v921_v4  ;;  %v946_v25 = vadd.f32 %v940_v19, %v921_v4 }
 0x25b   :  { %v947_v26 = vadd.f32 %v941_v20, %v921_v4  ;;  %v948_v27 = vadd.f32 %v942_v21, %v921_v4  ;;  %s1370_s20 = scalar_lea.vmem %s973_s30, 768  ;;  %p1375_p13 = scmp.lt.s32.totalorder %s973_s30, %s973_s30 }
 0x25c   :  { %v949_v28 = vadd.f32 %v943_v22, %v921_v4  ;;  %v950_v29 = vadd.f32 %v944_v23, %v921_v4  ;;  %951 = vst [vmem:[#allocation11] sm:$0xff] %v945_v24  ;;  %952 = vst [vmem:[#allocation11 + $0x8] sm:$0xff] %v946_v25  ;;  %p1371_p12 = scmp.ne.s32.totalorder %s973_s30, %s1370_s20  ;;  %p1376_p0 = scmp.lt.s32.totalorder %s1370_s20, %s1370_s20 }
 0x25d   :  { %953 = vst [vmem:[#allocation11 + $0x10] sm:$0xff] %v947_v26  ;;  %954 = vst [vmem:[#allocation11 + $0x18] sm:$0xff] %v948_v27 }
 0x25e   :  { %955 = vst [vmem:[#allocation11 + $0x20] sm:$0xff] %v949_v28  ;;  %956 = vst [vmem:[#allocation11 + $0x28] sm:$0xff] %v950_v29  ;;  %p1377_p1 = por %p1376_p0, %p1375_p13 }
 0x260   :  { %p1378_p2 = pnand %p1377_p1, %p1371_p12 }
 0x262   :  { %1381 = shalt.err (!%p1378_p2)
}
 0x263   :  { %s1382_s22 = scalar_lea.hbm %s1547_s7, 768 }
 0x264   :  { %p1383_p3 = scmp.ne.s32.totalorder %s1547_s7, %s1382_s22  ;;  %p1386_p4 = scmp.lt.u32.totalorder %s1382_s22, %s1547_s7 }
 0x266   :  { %p1388_p5 = pnand %p1386_p4, %p1383_p3 }
 0x268   :  { %1391 = shalt.err (!%p1388_p5)
}
 0x269   :  { %978 = dma.vmem_to_hbm [thread:$0]  %s973_s30, 768, %s1547_s7, [#allocation12], %s1407_s0, %s1407_s0, %s1408_s13  }
 0x26a   :  { %1398 = dma.done.wait [#allocation4], 384  }
 0x26b   :  { %1399 = vsyncadd [#allocation4], 4294966912 }
 0x26c   :  { %1400 = dma.done.wait [#allocation12], 768  }
 0x26d   :  { %1401 = vsyncadd [#allocation12], 4294966528 }
 0x26e   :  { %985 = vsyncpa [#allocation3], 1 }
 0x26f   :  { %986 = vsyncpa [#allocation6], 1 }
 0x270   :  { %987 = vsyncpa [#allocation9], 1 }
 0x271   :  { %988 = vsyncpa [#allocation4], 1 }
 0x272   :  { %989 = vsyncpa [#allocation12], 1 }

</bundles_post_ra>
